<compile_context>
chip_gen: v6e
topology: v6e:2x2x1
jax: 0.10.0
libtpu: 0.0.40
codegen_flags: <defaults>
</compile_context>

<pallas_src>
import jax
import jax.numpy as jnp
from jax.experimental import pallas as pl
from jax.experimental.pallas import tpu as pltpu
from typing import NamedTuple


LANE = 128     # TPU vreg lane width
SUBLANE = 8    # TPU vreg sublane count (f32)


def _round_up(n, m):
    return ((n + m - 1) // m) * m


def _cdiv(a, b):
    return -(-a // b)


class PreparedParams(NamedTuple):
    tensors: tuple   # (w1p, b1p, w2p, b2p, w3p, b3p) — padded / pre-cast, device-resident
    D: int           # logical input features
    H: int           # logical hidden size
    Hp: int          # lane-padded hidden size (multiple of 128)


def mlp_kernel(x_ref, w1_ref, b1_ref, w2_ref, b2_ref, w3_ref, b3_ref, o_ref):
    """Fused 3-layer MLP tile: 2 MXU matmuls + VPU bias/ReLU + VPU/XLU final reduce.

    x_ref:  (tb, D)    batch tile in the caller's dtype (f32 typically)
    w1_ref: (D, Hp)    layer-1 weight, (in, out) layout (f32 or bf16)
    b1_ref: (1, Hp)    layer-1 bias (f32)
    w2_ref: (Hp, Hp)   layer-2 weight (f32 or bf16)
    b2_ref: (1, Hp)    layer-2 bias (f32)
    w3_ref: (1, Hp)    layer-3 weight as a lane row (f32, VPU/XLU path)
    b3_ref: (1, 1)     layer-3 bias (f32)
    o_ref:  (tb, 1)    compact output column (f32)
    """
    # Cast x to the MXU dtype in-kernel (VPU, cheap) — x stays in its original
    # dtype in HBM so it is read exactly once, with no wrapper-side cast pass.
    x = x_ref[...].astype(w1_ref.dtype)

    # Layer 1: MXU matmul with f32 accumulation; bias + ReLU in f32 on the VPU.
    h1 = jnp.dot(x, w1_ref[...], preferred_element_type=jnp.float32)
    h1 = jnp.maximum(h1 + b1_ref[...], 0.0)

    # Layer 2: cast activations to the weight dtype (bf16 on the fast MXU path).
    h2 = jnp.dot(h1.astype(w2_ref.dtype), w2_ref[...],
                 preferred_element_type=jnp.float32)
    h2 = jnp.maximum(h2 + b2_ref[...], 0.0)

    # Layer 3 (out_features == 1): an N=1 MXU matmul would waste 127/128 of the
    # result columns; do it as a broadcast multiply + XLU lane reduction instead.
    y = jnp.sum(h2 * w3_ref[...], axis=-1, keepdims=True) + b3_ref[...]   # (tb, 1)

    # Compact store: the output column is only 4 B/row of HBM writeback (vs the
    # previous 128-wide slab's 512 B/row).  The width-1 block is the same pattern
    # as flash-attention LSE outputs and lowers cleanly.
    o_ref[...] = y.astype(o_ref.dtype)


def prepare_params(params, *, mxu_dtype=jnp.bfloat16):
    """One-time preparation: pad hidden dim to lane width + pre-cast MXU operands.

    Zero padding is exact: padded hidden units see 0 weight + 0 bias, ReLU(0)=0,
    and contribute 0 downstream.  bf16 MXU inputs (default) hit the native MXU
    path on v5e/v6e/v7x and halve weight DMA bytes; accumulation and all VPU work
    (bias, ReLU, final reduce) stay f32.
    """
    w1, b1, w2, b2, w3, b3 = params
    D, H = w1.shape
    assert w2.shape == (H, H) and w3.shape[0] == H
    Hp = _round_up(max(H, LANE), LANE)
    f32 = jnp.float32

    w1p = jnp.zeros((D, Hp), f32).at[:, :H].set(w1.astype(f32)).astype(mxu_dtype)
    w2p = jnp.zeros((Hp, Hp), f32).at[:H, :H].set(w2.astype(f32)).astype(mxu_dtype)
    b1p = jnp.zeros((1, Hp), f32).at[:, :H].set(jnp.reshape(b1, (1, H)).astype(f32))
    b2p = jnp.zeros((1, Hp), f32).at[:, :H].set(jnp.reshape(b2, (1, H)).astype(f32))
    w3p = jnp.zeros((1, Hp), f32).at[:, :H].set(jnp.reshape(w3, (1, H)).astype(f32))
    b3p = jnp.reshape(jnp.asarray(b3, f32), (1, 1))

    tensors = tuple(jax.device_put(t) for t in (w1p, b1p, w2p, b2p, w3p, b3p))
    return PreparedParams(tensors=tensors, D=int(D), H=int(H), Hp=int(Hp))


def _pick_batch_tile(B, *, max_tb=1024, align=SUBLANE):
    """Batch tile: big enough to amortize ~0.35 us/grid-step, but grid >= 2 for
    larger batches so v7x's two TensorCores both get work."""
    b_aligned = _round_up(max(B, 1), align)
    if b_aligned <= 2 * align:
        return b_aligned                      # tiny batch: one small tile
    half = _round_up(_cdiv(b_aligned, 2), align)
    return min(max_tb, half)


def neural_network_forward(x, prepared: PreparedParams, *, max_tb=1024):
    """Pallas forward for NeuralNetwork. Returns (B, 1) f32."""
    w1p, b1p, w2p, b2p, w3p, b3p = prepared.tensors
    D, Hp = prepared.D, prepared.Hp
    B, Dx = x.shape
    assert Dx == D, f"input features {Dx} != model input_shape {D}"

    itemsize = jnp.dtype(x.dtype).itemsize
    # x blocks must match the packed sublane tile of their own dtype
    # (8 rows for f32, 16 for bf16, 32 for 1-byte types).
    align = max(SUBLANE, 32 // max(itemsize, 1))
    tb_eff = _pick_batch_tile(B, max_tb=max_tb, align=align)
    Bp = _round_up(B, tb_eff)
    grid = (Bp // tb_eff,)

    # Only pad the batch dim, and only when needed (padded rows are sliced off).
    xp = x if Bp == B else jnp.pad(x, ((0, Bp - B), (0, 0)))

    # VMEM budget from the actual footprint (double-buffered x/out, resident
    # weights, f32 intermediates) + generous margin; stays well below v7x's
    # 64 MiB physical VMEM so the compiler keeps headroom for scratch.
    w_bytes = (w1p.size * w1p.dtype.itemsize + w2p.size * w2p.dtype.itemsize
               + (b1p.size + b2p.size + w3p.size + b3p.size) * 4)
    footprint = (2 * tb_eff * D * itemsize      # x double buffer
                 + 2 * tb_eff * 4               # out double buffer
                 + 2 * w_bytes                  # weights (conservatively x2)
                 + 4 * tb_eff * Hp * 4)         # h1/h2 f32 live values
    vmem_limit = int(min(max(2 * footprint + (1 << 21), 8 << 20), 56 << 20))

    flops = 2 * Bp * (D * Hp + Hp * Hp + Hp)
    bytes_accessed = (xp.size * itemsize + w_bytes + Bp * 4)

    out = pl.pallas_call(
        mlp_kernel,
        out_shape=jax.ShapeDtypeStruct((Bp, 1), jnp.float32),
        grid_spec=pltpu.PrefetchScalarGridSpec(
            num_scalar_prefetch=0,
            grid=grid,
            in_specs=[
                # x: batch-tiled, full-extent feature dim (no feature padding).
                # If the x DMA ever becomes exposed at large tb, add
                # pipeline_mode=pl.Buffered(3) here (weights are already resident).
                pl.BlockSpec((tb_eff, D), lambda i: (i, 0)),
                # Weights/biases are constant-index full blocks: fetched once,
                # resident in VMEM across all grid steps (tiny at Hp=128).
                pl.BlockSpec((D, Hp), lambda i: (0, 0)),   # W1
                pl.BlockSpec((1, Hp), lambda i: (0, 0)),   # b1
                pl.BlockSpec((Hp, Hp), lambda i: (0, 0)),  # W2
                pl.BlockSpec((1, Hp), lambda i: (0, 0)),   # b2
                pl.BlockSpec((1, Hp), lambda i: (0, 0)),   # w3 row
                pl.BlockSpec((1, 1), lambda i: (0, 0)),    # b3
            ],
            out_specs=pl.BlockSpec((tb_eff, 1), lambda i: (i, 0)),
        ),
        compiler_params=pltpu.CompilerParams(
            dimension_semantics=("parallel",),   # batch tiles shard across v7x's 2 TCs
            vmem_limit_bytes=vmem_limit,
        ),
        cost_estimate=pl.CostEstimate(
            flops=flops, transcendentals=0, bytes_accessed=bytes_accessed),
    )(xp, w1p, b1p, w2p, b2p, w3p, b3p)

    return out[:B]


def init_params(key, input_shape, hidden_size):
    """Deterministic init mimicking nn.Linear's uniform(-1/sqrt(fan_in), +)."""
    ks = jax.random.split(key, 6)

    def lin(kw, kb, fan_in, fan_out):
        bound = 1.0 / jnp.sqrt(fan_in)
        # stored as (in, out): transposed relative to PyTorch's (out, in)
        w = jax.random.uniform(kw, (fan_in, fan_out), jnp.float32, -bound, bound)
        b = jax.random.uniform(kb, (1, fan_out), jnp.float32, -bound, bound)
        return w, b

    w1, b1 = lin(ks[0], ks[1], input_shape, hidden_size)
    w2, b2 = lin(ks[2], ks[3], hidden_size, hidden_size)
    w3, b3 = lin(ks[4], ks[5], hidden_size, 1)
    return (w1, b1, w2, b2, w3, b3)


def reference_forward(x, params):
    w1, b1, w2, b2, w3, b3 = params
    h1 = jnp.maximum(x @ w1 + b1, 0.0)
    h2 = jnp.maximum(h1 @ w2 + b2, 0.0)
    return h2 @ w3 + b3


if __name__ == "__main__":
    key = jax.random.PRNGKey(0)
    kx, kp, kx2 = jax.random.split(key, 3)

    # Small shapes implied by the module.
    batch, input_shape, hidden_size = 8, 32, 32
    x = jax.random.normal(kx, (batch, input_shape), dtype=jnp.float32)
    params = init_params(kp, input_shape, hidden_size)

    # f32 MXU path: exact check against the JAX reference (single tiny tile).
    prep_f32 = prepare_params(params, mxu_dtype=jnp.float32)
    out = jax.block_until_ready(neural_network_forward(x, prep_f32))
    ref = reference_forward(x, params)
    assert out.shape == (batch, 1)
    assert jnp.allclose(out, ref, atol=1e-5, rtol=1e-5), "f32 mismatch vs reference"

    # Default bf16 MXU path (params prepared/cast once, reused across calls);
    # larger batch splits into 2 tiles -> grid=(2,) exercises both v7x TCs.
    prep = prepare_params(params)   # default: bf16 MXU operands, f32 accumulation
    batch2 = 256
    x2 = jax.random.normal(kx2, (batch2, input_shape), dtype=jnp.float32)
    out2 = jax.block_until_ready(neural_network_forward(x2, prep))
    ref2 = reference_forward(x2, params)
    assert out2.shape == (batch2, 1)
    assert jnp.allclose(out2, ref2, atol=1e-1, rtol=1e-1), "bf16 mismatch vs reference"

    # Re-run the small batch through the cached bf16 params (no re-padding cost).
    out3 = jax.block_until_ready(neural_network_forward(x, prep))
    assert out3.shape == (batch, 1)
    assert jnp.allclose(out3, ref, atol=1e-1, rtol=1e-1), "bf16 small-batch mismatch"

    print("KERNEL_OK")
</pallas_src>

<mosaic_0001>
module attributes {stable_mosaic.version = 11 : i64} {
  func.func @mlp_kernel(%arg0: i32, %arg1: memref<8x32xf32, #tpu.memory_space<vmem>>, %arg2: memref<32x128xf32, #tpu.memory_space<vmem>>, %arg3: memref<1x128xf32, #tpu.memory_space<vmem>>, %arg4: memref<128x128xf32, #tpu.memory_space<vmem>>, %arg5: memref<1x128xf32, #tpu.memory_space<vmem>>, %arg6: memref<1x128xf32, #tpu.memory_space<vmem>>, %arg7: memref<1x1xf32, #tpu.memory_space<vmem>>, %arg8: memref<8x1xf32, #tpu.memory_space<vmem>>) attributes {dimension_semantics = [#tpu.dimension_semantics<parallel>], iteration_bounds = array<i64: 1>, scalar_prefetch = 0 : i64, scratch_operands = 0 : i64, tpu.core_type = #tpu.core_type<tc>, window_params = [{transform_indices = @transform_0, window_bounds = array<i64: 8, 32>}, {pipeline_mode = #tpu.pipeline_mode<synchronous>, transform_indices = @transform_1, window_bounds = array<i64: 32, 128>}, {pipeline_mode = #tpu.pipeline_mode<synchronous>, transform_indices = @transform_2, window_bounds = array<i64: 1, 128>}, {pipeline_mode = #tpu.pipeline_mode<synchronous>, transform_indices = @transform_3, window_bounds = array<i64: 128, 128>}, {pipeline_mode = #tpu.pipeline_mode<synchronous>, transform_indices = @transform_4, window_bounds = array<i64: 1, 128>}, {pipeline_mode = #tpu.pipeline_mode<synchronous>, transform_indices = @transform_5, window_bounds = array<i64: 1, 128>}, {pipeline_mode = #tpu.pipeline_mode<synchronous>, transform_indices = @transform_6, window_bounds = array<i64: 1, 1>}, {transform_indices = @transform_7, window_bounds = array<i64: 8, 1>}]} {
    %c0 = arith.constant 0 : index
    %c0_0 = arith.constant 0 : index
    %0 = vector.load %arg1[%c0, %c0_0] : memref<8x32xf32, #tpu.memory_space<vmem>>, vector<8x32xf32>
    %c0_1 = arith.constant 0 : index
    %c0_2 = arith.constant 0 : index
    %1 = vector.load %arg2[%c0_1, %c0_2] : memref<32x128xf32, #tpu.memory_space<vmem>>, vector<32x128xf32>
    %cst = arith.constant dense<0.000000e+00> : vector<8x128xf32>
    %2 = tpu.matmul %0, %1, %cst {dimension_numbers = #tpu.dot_dimension_numbers<[1], [0], [0], [1], [0, 0, 1, 1], [], []>} : vector<8x32xf32>, vector<32x128xf32>, vector<8x128xf32> -> vector<8x128xf32>
    %c0_3 = arith.constant 0 : index
    %c0_4 = arith.constant 0 : index
    %3 = vector.load %arg3[%c0_3, %c0_4] : memref<1x128xf32, #tpu.memory_space<vmem>>, vector<1x128xf32>
    %4 = vector.broadcast %3 : vector<1x128xf32> to vector<8x128xf32>
    %5 = arith.addf %2, %4 : vector<8x128xf32>
    %cst_5 = arith.constant 0.000000e+00 : f32
    %6 = vector.broadcast %cst_5 : f32 to vector<8x128xf32>
    %7 = arith.maximumf %5, %6 : vector<8x128xf32>
    %c0_6 = arith.constant 0 : index
    %c0_7 = arith.constant 0 : index
    %8 = vector.load %arg4[%c0_6, %c0_7] : memref<128x128xf32, #tpu.memory_space<vmem>>, vector<128x128xf32>
    %cst_8 = arith.constant dense<0.000000e+00> : vector<8x128xf32>
    %9 = tpu.matmul %7, %8, %cst_8 {dimension_numbers = #tpu.dot_dimension_numbers<[1], [0], [0], [1], [0, 0, 1, 1], [], []>} : vector<8x128xf32>, vector<128x128xf32>, vector<8x128xf32> -> vector<8x128xf32>
    %c0_9 = arith.constant 0 : index
    %c0_10 = arith.constant 0 : index
    %10 = vector.load %arg5[%c0_9, %c0_10] : memref<1x128xf32, #tpu.memory_space<vmem>>, vector<1x128xf32>
    %11 = vector.broadcast %10 : vector<1x128xf32> to vector<8x128xf32>
    %12 = arith.addf %9, %11 : vector<8x128xf32>
    %cst_11 = arith.constant 0.000000e+00 : f32
    %13 = vector.broadcast %cst_11 : f32 to vector<8x128xf32>
    %14 = arith.maximumf %12, %13 : vector<8x128xf32>
    %c0_12 = arith.constant 0 : index
    %c0_13 = arith.constant 0 : index
    %15 = vector.load %arg6[%c0_12, %c0_13] : memref<1x128xf32, #tpu.memory_space<vmem>>, vector<1x128xf32>
    %16 = vector.broadcast %15 : vector<1x128xf32> to vector<8x128xf32>
    %17 = arith.mulf %14, %16 : vector<8x128xf32>
    %cst_14 = arith.constant dense<0.000000e+00> : vector<8xf32>
    %18 = vector.multi_reduction <add>, %17, %cst_14 [1] : vector<8x128xf32> to vector<8xf32>
    %19 = vector.shape_cast %18 : vector<8xf32> to vector<8x1xf32>
    %c0_15 = arith.constant 0 : index
    %c0_16 = arith.constant 0 : index
    %20 = vector.load %arg7[%c0_15, %c0_16] : memref<1x1xf32, #tpu.memory_space<vmem>>, vector<1x1xf32>
    %21 = vector.broadcast %20 : vector<1x1xf32> to vector<8x1xf32>
    %22 = arith.addf %19, %21 : vector<8x1xf32>
    %c0_17 = arith.constant 0 : index
    %c0_18 = arith.constant 0 : index
    %23 = vector.load %arg8[%c0_17, %c0_18] : memref<8x1xf32, #tpu.memory_space<vmem>>, vector<8x1xf32>
    tpu.vector_store %arg8[%c0_17, %c0_18], %22 {strides = array<i32>} : memref<8x1xf32, #tpu.memory_space<vmem>>, vector<8x1xf32>,
    return
  }
  func.func @transform_0(%arg0: i32) -> (i32, i32) {
    %c0_i32 = arith.constant 0 : i32
    %c0_i32_0 = arith.constant 0 : i32
    return %arg0, %c0_i32 : i32, i32
  }
  func.func @transform_1(%arg0: i32) -> (i32, i32) {
    %c0_i32 = arith.constant 0 : i32
    %c0_i32_0 = arith.constant 0 : i32
    %c0_i32_1 = arith.constant 0 : i32
    return %c0_i32, %c0_i32_0 : i32, i32
  }
  func.func @transform_2(%arg0: i32) -> (i32, i32) {
    %c0_i32 = arith.constant 0 : i32
    %c0_i32_0 = arith.constant 0 : i32
    %c0_i32_1 = arith.constant 0 : i32
    return %c0_i32, %c0_i32_0 : i32, i32
  }
  func.func @transform_3(%arg0: i32) -> (i32, i32) {
    %c0_i32 = arith.constant 0 : i32
    %c0_i32_0 = arith.constant 0 : i32
    %c0_i32_1 = arith.constant 0 : i32
    return %c0_i32, %c0_i32_0 : i32, i32
  }
  func.func @transform_4(%arg0: i32) -> (i32, i32) {
    %c0_i32 = arith.constant 0 : i32
    %c0_i32_0 = arith.constant 0 : i32
    %c0_i32_1 = arith.constant 0 : i32
    return %c0_i32, %c0_i32_0 : i32, i32
  }
  func.func @transform_5(%arg0: i32) -> (i32, i32) {
    %c0_i32 = arith.constant 0 : i32
    %c0_i32_0 = arith.constant 0 : i32
    %c0_i32_1 = arith.constant 0 : i32
    return %c0_i32, %c0_i32_0 : i32, i32
  }
  func.func @transform_6(%arg0: i32) -> (i32, i32) {
    %c0_i32 = arith.constant 0 : i32
    %c0_i32_0 = arith.constant 0 : i32
    %c0_i32_1 = arith.constant 0 : i32
    return %c0_i32, %c0_i32_0 : i32, i32
  }
  func.func @transform_7(%arg0: i32) -> (i32, i32) {
    %c0_i32 = arith.constant 0 : i32
    %c0_i32_0 = arith.constant 0 : i32
    return %arg0, %c0_i32 : i32, i32
  }
}

</mosaic_0001>

<bundles_post_ra>
// kernel: tpu_custom_call.1
= control target key start
LH: loop header
LB: loop body
LE: loop exit
PB: predicated region body
PF: predicated region fallthrough
CT: control target
= control target key end

     0   :  { %s511_s0 = inlined_call_operand.hbm [shape: f32[8,32], index: 0, kind: input, shape index: {}]   ;;  %s512_s1 = inlined_call_operand.hbm [shape: f32[32,128], index: 1, kind: input, shape index: {}]   ;;  %s513_s2 = inlined_call_operand.vmem [shape: f32[1,128], index: 2, kind: input, shape index: {}]   ;;  %s514_s3 = inlined_call_operand.hbm [shape: f32[128,128], index: 3, kind: input, shape index: {}]   ;;  %s515_s4 = inlined_call_operand.vmem [shape: f32[1,128], index: 4, kind: input, shape index: {}]   ;;  %s516_s5 = inlined_call_operand.vmem [shape: f32[1,128], index: 5, kind: input, shape index: {}]   ;;  %s517_s6 = inlined_call_operand.<no memory space> [shape: f32[1,1], index: 6, kind: input, shape index: {}]   ;;  %s518_s7 = inlined_call_operand.vmem [shape: f32[8,1], index: 7, kind: output, shape index: {}]  }
   0x1   :  { %v12_v0 = vstv %s517_s6 }
   0x2   :  { %13 = vst [vmem:[#allocation2] sm:$0x1] %v12_v0 }
   0x3   :  { %14 = vsyncpa [#allocation4], 0 }
   0x4   :  { %15 = vsyncpa [#allocation6], 0  ;;  %s418_s26 = smov [#allocation5]  }
   0x5   :  { %s31_s27 = sshll.u32 %s418_s26, 4  ;;  %s32_s27 = int_to_ptr.vmem [resolvable:$true] %s31_s27 }
   0x6   :  { %s362_s28 = scalar_lea.vmem %s32_s27, 512  ;;  %p367_p1 = scmp.lt.s32.totalorder %s32_s27, %s32_s27 }
   0x7   :  { %p363_p0 = scmp.ne.s32.totalorder %s32_s27, %s362_s28  ;;  %p368_p2 = scmp.lt.s32.totalorder %s362_s28, %s362_s28 }
   0x9   :  { %p369_p3 = por %p368_p2, %p367_p1 }
   0xb   :  { %p370_p4 = pnand %p369_p3, %p363_p0 }
   0xd   :  { %373 = shalt.err (!%p370_p4)
}
   0xe   :  { %s419_s29 = smov 128   ;;  %s420_s30 = smov 8  }
   0xf   :  { %37 = dma.hbm_to_vmem [thread:$0]  %s512_s1, 512, %s32_s27, [#allocation6], %s419_s29, %s419_s29, %s420_s30  }
  0x10   :  { %s421_s6 = smov [#allocation3]   ;;  %s422_s11 = smov [#allocation7]  }
  0x11   :  { %s22_s10 = sshll.u32 %s421_s6, 4  ;;  %s45_s12 = sshll.u32 %s422_s11, 4  ;;  %s23_s10 = int_to_ptr.vmem [resolvable:$true] %s22_s10  ;;  %s46_s12 = int_to_ptr.vmem [resolvable:$true] %s45_s12 }
  0x12   :  { %s382_s13 = scalar_lea.vmem %s23_s10, 128  ;;  %p387_p6 = scmp.lt.s32.totalorder %s23_s10, %s23_s10 }
  0x13   :  { %p383_p5 = scmp.ne.s32.totalorder %s23_s10, %s382_s13  ;;  %p388_p7 = scmp.lt.s32.totalorder %s382_s13, %s382_s13 }
  0x15   :  { %p389_p8 = por %p388_p7, %p387_p6 }
  0x17   :  { %p390_p9 = pnand %p389_p8, %p383_p5 }
  0x19   :  { %393 = shalt.err (!%p390_p9)
}
  0x1a   :  { %25 = dma.hbm_to_vmem [thread:$0]  %s511_s0, 128, %s23_s10, [#allocation4]  }
  0x1b   :  { %s402_s16 = scalar_lea.vmem %s46_s12, 2048  ;;  %p407_p11 = scmp.lt.s32.totalorder %s46_s12, %s46_s12 }
  0x1c   :  { %p403_p10 = scmp.ne.s32.totalorder %s46_s12, %s402_s16  ;;  %p408_p12 = scmp.lt.s32.totalorder %s402_s16, %s402_s16 }
  0x1e   :  { %p409_p13 = por %p408_p12, %p407_p11 }
  0x20   :  { %p410_p0 = pnand %p409_p13, %p403_p10 }
  0x22   :  { %413 = shalt.err (!%p410_p0)
}
  0x23   :  { %51 = dma.hbm_to_vmem [thread:$0]  %s514_s3, 2048, %s46_s12, [#allocation6], %s419_s29, %s419_s29, %s420_s30  }
  0x24   :  { %414 = dma.done.wait [#allocation4], 128  }
  0x25   :  { %415 = vsyncadd [#allocation4], 4294967168 }
  0x26   :  { %416 = dma.done.wait [#allocation6], 2560  }
  0x27   :  { %417 = vsyncadd [#allocation6], 4294964736  ;;  %v423_v1 = vmov 0.0   ;;  %vm424_vm0 = vmmov 0   ;;  %v71_v2 = vld [vmem:[#allocation5 + $0x18] sm:$0xff]  ;;  %v70_v3 = vld [vmem:[#allocation5 + $0x10] sm:$0xff] }
  0x28   :  { %301 = vmatprep.subr.mxu0 %v423_v1  ;;  %309 = vmatprep.mubr.msk.f32.mxu0 %vm424_vm0, %v423_v1  ;;  %v169_v4 = vld [vmem:[#allocation7 + $0x78] sm:$0xff]  ;;  %v69_v5 = vld [vmem:[#allocation5 + $0x8] sm:$0xff]  ;;  %v168_v6 = vld [vmem:[#allocation7 + $0x70] sm:$0xff]  ;;  %vm79_vm1 = vcmask 261120   ;;  %vm266_vm2 = vcmask 7168  }
  0x29   :  { %312 = vmatprep.subr.mxu1 %v423_v1  ;;  %344 = vmatprep.mubr.msk.f32.mxu1 %vm424_vm0, %v423_v1  ;;  %v167_v7 = vld [vmem:[#allocation7 + $0x68] sm:$0xff]  ;;  %v68_v8 = vld [vmem:[#allocation5] sm:$0xff]  ;;  %v67_v9 = vld [vmem:[#allocation3] sm:$0xff] }
  0x2a   :  { %302 = vmatpush3.msra.mxu0 %v71_v2  ;;  %313 = vmatpush3.msra.mxu1 %v169_v4  ;;  %v166_v10 = vld [vmem:[#allocation7 + $0x60] sm:$0xff]  ;;  %v165_v11 = vld [vmem:[#allocation7 + $0x58] sm:$0xff]  ;;  %v164_v12 = vld [vmem:[#allocation7 + $0x50] sm:$0xff] }
  0x2b   :  { %303 = vmatprep.subr.mxu0 %v423_v1  ;;  %314 = vmatprep.subr.mxu1 %v423_v1  ;;  %v163_v13 = vld [vmem:[#allocation7 + $0x48] sm:$0xff]  ;;  %v162_v14 = vld [vmem:[#allocation7 + $0x40] sm:$0xff]  ;;  %v161_v15 = vld [vmem:[#allocation7 + $0x38] sm:$0xff] }
  0x2c   :  { %304 = vmatpush3.msra.mxu0 %v70_v3  ;;  %315 = vmatpush3.msra.mxu1 %v168_v6  ;;  %v160_v16 = vld [vmem:[#allocation7 + $0x30] sm:$0xff]  ;;  %v159_v17 = vld [vmem:[#allocation7 + $0x28] sm:$0xff]  ;;  %v158_v18 = vld [vmem:[#allocation7 + $0x20] sm:$0xff] }
  0x2d   :  { %305 = vmatprep.subr.mxu0 %v423_v1  ;;  %316 = vmatprep.subr.mxu1 %v423_v1  ;;  %v157_v19 = vld [vmem:[#allocation7 + $0x18] sm:$0xff]  ;;  %v156_v20 = vld [vmem:[#allocation7 + $0x10] sm:$0xff]  ;;  %v155_v21 = vld [vmem:[#allocation7 + $0x8] sm:$0xff] }
  0x2e   :  { %306 = vmatpush3.msra.mxu0 %v69_v5  ;;  %317 = vmatpush3.msra.mxu1 %v167_v7  ;;  %v154_v22 = vld [vmem:[#allocation7] sm:$0xff]  ;;  %v274_v23 = vld [vmem:[%s513_s2] ss:$0 sm:$0xff] }
  0x2f   :  { %307 = vmatprep.subr.mxu0 %v423_v1  ;;  %318 = vmatprep.subr.mxu1 %v423_v1  ;;  %v276_v28 = vld [vmem:[%s515_s4] ss:$0 sm:$0xff] }
  0x30   :  { %308 = vmatpush3.msra.mxu0 %v68_v8  ;;  %319 = vmatpush3.msra.mxu1 %v166_v10  ;;  %v277_v32 = vld [vmem:[%s516_s5] ss:$0 sm:$0xff] }
  0x31   :  { %310 = vmatmul.mubr.msk.f32.vlgmr.msra.gmra.mxu0 %vm79_vm1, %v67_v9  ;;  %320 = vmatprep.subr.mxu1 %v423_v1  ;;  %v278_v35 = vld [vmem:[#allocation2] ss:$0 sm:$0xff] }
  0x32   :  { %321 = vmatpush3.msra.mxu1 %v165_v11 }
  0x33   :  { %322 = vmatprep.subr.mxu1 %v423_v1 }
  0x34   :  { %323 = vmatpush3.msra.mxu1 %v164_v12 }
  0x35   :  { %324 = vmatprep.subr.mxu1 %v423_v1 }
  0x36   :  { %325 = vmatpush3.msra.mxu1 %v163_v13 }
  0x37   :  { %326 = vmatprep.subr.mxu1 %v423_v1 }
  0x38   :  { %327 = vmatpush3.msra.mxu1 %v162_v14 }
  0x39   :  { %328 = vmatprep.subr.mxu1 %v423_v1 }
  0x3a   :  { %329 = vmatpush3.msra.mxu1 %v161_v15 }
  0x3b   :  { %330 = vmatprep.subr.mxu1 %v423_v1 }
  0x3c   :  { %331 = vmatpush3.msra.mxu1 %v160_v16 }
  0x3d   :  { %332 = vmatprep.subr.mxu1 %v423_v1 }
  0x3e   :  { %333 = vmatpush3.msra.mxu1 %v159_v17 }
  0x3f   :  { %334 = vmatprep.subr.mxu1 %v423_v1 }
  0x40   :  { %335 = vmatpush3.msra.mxu1 %v158_v18 }
  0x41   :  { %336 = vmatprep.subr.mxu1 %v423_v1 }
  0x42   :  { %337 = vmatpush3.msra.mxu1 %v157_v19 }
  0x43   :  { %338 = vmatprep.subr.mxu1 %v423_v1 }
  0x44   :  { %339 = vmatpush3.msra.mxu1 %v156_v20 }
  0x45   :  { %340 = vmatprep.subr.mxu1 %v423_v1 }
  0x46   :  { %341 = vmatpush3.msra.mxu1 %v155_v21 }
  0x47   :  { %342 = vmatprep.subr.mxu1 %v423_v1 }
  0x48   :  { %343 = vmatpush3.msra.mxu1 %v154_v22 }
  0xf1   :  { %v149_v24 = vpop.f32.mrf.mxu0 }
  0xf2   :  { %v150_v25 = vadd.f32 %v274_v23, %v149_v24 }
  0xf3   :  { %v311_v26 = vpop.f32.mrf.mxu0 }
  0xf4   :  { %v153_v27 = vmax.f32 %v150_v25, 0.0 }
  0xf6   :  { %345 = vmatmul.mubr.f32.vlgmr.msra.gmra.mxu1 %v153_v27 }
 0x1b6   :  { %v243_v29 = vpop.f32.mrf.mxu1 }
 0x1b7   :  { %v244_v30 = vadd.f32 %v276_v28, %v243_v29 }
 0x1b8   :  { %v346_v31 = vpop.f32.mrf.mxu1 }
 0x1b9   :  { %v247_v33 = vmax.f32 %v244_v30, 0.0 }
 0x1bb   :  { %v255_v34 = vmul.f32 %v277_v32, %v247_v33 }
 0x1bd   :  { %256 = vadd.xlane.f32.xlu0 %v255_v34 }
 0x246   :  { %v257_v36 = vpop.xlane.xlu0 %256 }
 0x247   :  { %v265_v37 = vadd.f32 %v278_v35, %v257_v36 }
 0x249   :  { %267 = vst.msk [vmem:[%s518_s7] sm:$0xff] %vm266_vm2, %v265_v37 }
 0x24a   :  { %272 = vsyncpa [#allocation4], 1 }
 0x24b   :  { %273 = vsyncpa [#allocation6], 1 }

</bundles_post_ra>
